<compile_context>
chip_gen: v5e
topology: v5e:2x2
jax: 0.10.0
libtpu: 0.0.40
codegen_flags: <defaults>
</compile_context>

<pallas_src>
import functools

import jax
import jax.numpy as jnp
from jax.experimental import pallas as pl
from jax.experimental.pallas import tpu as pltpu

LANE = 128
ALIGN = 16          # bf16 sublane packing (rows); also keeps sub-chunks aligned


def _round_up(x, m):
    return (x + m - 1) // m * m


def _sigmoid(x):
    # Single-EUP-op sigmoid: sigmoid(x) == 0.5 * tanh(0.5 * x) + 0.5
    return 0.5 * jnp.tanh(0.5 * x) + 0.5


def mlp_kernel(x_ref, w1_ref, w2_ref, w3_ref, b_ref, o_ref, *,
               hidden, a_pad, n_chunks):
    b = b_ref[...]                       # (3, P) f32 packed biases
    b1 = b[0:1, :hidden]
    b2 = b[1:2, :hidden]
    b3 = b[2:3, :a_pad]
    w1 = w1_ref[...]                     # (S, H)     bf16, VMEM-resident
    w2 = w2_ref[...]                     # (H, H)     bf16, VMEM-resident
    w3 = w3_ref[...]                     # (H, A_pad) bf16, VMEM-resident

    tile_b = x_ref.shape[0]
    cs = tile_b // n_chunks

    # Static sub-chunk loop: independent fc1->fc2->fc3 chains let the scheduler
    # overlap chunk k+1's MXU passes with chunk k's tanh / relu epilogue.
    for c in range(n_chunks):
        rows = pl.ds(c * cs, cs)
        x = x_ref[rows, :]                                              # (cs, S) bf16

        h1 = jnp.dot(x, w1, preferred_element_type=jnp.float32)        # f32 acc
        h1 = _sigmoid(h1 + b1)

        h2 = jnp.dot(h1.astype(w2.dtype), w2,
                     preferred_element_type=jnp.float32)
        h2 = jnp.maximum(h2 + b2, 0.0)

        h3 = jnp.dot(h2.astype(w3.dtype), w3,
                     preferred_element_type=jnp.float32)
        # Lane-dense bf16 store (A_pad multiple of 128).
        o_ref[rows, :] = _sigmoid(h3 + b3).astype(o_ref.dtype)


def prepare_params(params):
    """One-time prep: pad/cast weights to bf16, pack biases. Hoisted out of the
    per-call path so an inference loop doesn't repay these XLA ops every step."""
    w1, b1 = params["w1"], params["b1"]
    w2, b2 = params["w2"], params["b2"]
    w3, b3 = params["w3"], params["b3"]

    S, H = w1.shape
    A = w3.shape[1]
    A_pad = _round_up(A, LANE)          # lane-dense output / fc3 columns
    P = max(H, A_pad)

    # Pad fc3 to A_pad zero columns (sliced off after the kernel).
    w3p = jnp.zeros((H, A_pad), w3.dtype).at[:, :A].set(w3)

    # Pack all biases into a single (3, P) f32 operand (one small DMA).
    b_all = jnp.zeros((3, P), jnp.float32)
    b_all = b_all.at[0, :H].set(b1.reshape(-1))
    b_all = b_all.at[1, :H].set(b2.reshape(-1))
    b_all = b_all.at[2, :A].set(b3.reshape(-1))

    return {
        "w1": w1.astype(jnp.bfloat16),
        "w2": w2.astype(jnp.bfloat16),
        "w3": w3p.astype(jnp.bfloat16),
        "b_all": b_all,
        "S": S, "H": H, "A": A, "A_pad": A_pad, "P": P,
    }


def net_forward(x, prepped, *, tile_b=2048):
    """x: (B, state_size) float32; prepped: output of prepare_params."""
    B, S = x.shape
    assert S == prepped["S"]
    H, A, A_pad, P = prepped["H"], prepped["A"], prepped["A_pad"], prepped["P"]

    # --- batch tiling -------------------------------------------------------
    B_aln = _round_up(B, ALIGN)
    n_tiles = max(1, -(-B_aln // tile_b))
    # v7x has 2 TensorCores: guarantee >=2 grid steps whenever the batch allows,
    # so the "parallel" axis can actually be sharded across both cores.
    if n_tiles == 1 and B_aln >= 2 * ALIGN:
        n_tiles = 2
    tile_b = _round_up(-(-B_aln // n_tiles), ALIGN)
    B_pad = n_tiles * tile_b            # padding waste bounded by ~n_tiles*ALIGN rows

    # Sub-chunk the tile only when each chunk stays sublane-pack aligned.
    n_chunks = 2 if (tile_b % (2 * ALIGN) == 0) else 1

    # Cast to bf16 *before* the padding copy (single wrapper-side pass).
    xb = x.astype(jnp.bfloat16)
    if B_pad != B:
        xb = jnp.zeros((B_pad, S), jnp.bfloat16).at[:B, :].set(xb)

    grid = (n_tiles,)
    flops = 2 * B_pad * (S * H + H * H + H * A_pad)
    bytes_accessed = (xb.size * 2
                      + prepped["w1"].size * 2 + prepped["w2"].size * 2
                      + prepped["w3"].size * 2 + prepped["b_all"].size * 4
                      + B_pad * A_pad * 2)              # bf16 output stream

    out = pl.pallas_call(
        functools.partial(mlp_kernel, hidden=H, a_pad=A_pad, n_chunks=n_chunks),
        out_shape=jax.ShapeDtypeStruct((B_pad, A_pad), jnp.bfloat16),
        grid_spec=pltpu.PrefetchScalarGridSpec(
            num_scalar_prefetch=0,
            grid=grid,
            in_specs=[
                pl.BlockSpec((tile_b, S), lambda i: (i, 0)),    # x: tiled over batch
                pl.BlockSpec((S, H), lambda i: (0, 0)),         # W1: VMEM-resident
                pl.BlockSpec((H, H), lambda i: (0, 0)),         # W2: VMEM-resident
                pl.BlockSpec((H, A_pad), lambda i: (0, 0)),     # W3 (padded): resident
                pl.BlockSpec((3, P), lambda i: (0, 0)),         # packed biases: resident
            ],
            out_specs=pl.BlockSpec((tile_b, A_pad), lambda i: (i, 0)),
        ),
        compiler_params=pltpu.CompilerParams(
            dimension_semantics=("parallel",)),
        cost_estimate=pl.CostEstimate(
            flops=flops,
            transcendentals=B_pad * (H + A_pad),
            bytes_accessed=bytes_accessed),
    )(xb, prepped["w1"], prepped["w2"], prepped["w3"], prepped["b_all"])

    # Slice off batch/action padding; return f32 for downstream consumers.
    return out[:B, :A].astype(jnp.float32)


def init_params(key, state_size, action_size, hidden_size=128):
    """Deterministic init mimicking torch.nn.Linear defaults (uniform +/- 1/sqrt(fan_in))."""
    ks = jax.random.split(key, 6)

    def linear(kw, kb, fan_in, fan_out):
        bound = 1.0 / jnp.sqrt(fan_in)
        w = jax.random.uniform(kw, (fan_in, fan_out), jnp.float32, -bound, bound)
        b = jax.random.uniform(kb, (1, fan_out), jnp.float32, -bound, bound)
        return w, b

    w1, b1 = linear(ks[0], ks[1], state_size, hidden_size)
    w2, b2 = linear(ks[2], ks[3], hidden_size, hidden_size)
    w3, b3 = linear(ks[4], ks[5], hidden_size, action_size)
    return {"w1": w1, "b1": b1, "w2": w2, "b2": b2, "w3": w3, "b3": b3}


def net_forward_ref(x, p):
    h1 = jax.nn.sigmoid(x @ p["w1"] + p["b1"])
    h2 = jnp.maximum(h1 @ p["w2"] + p["b2"], 0.0)
    return jax.nn.sigmoid(h2 @ p["w3"] + p["b3"])


if __name__ == "__main__":
    state_size, action_size, hidden_size = 16, 8, 128
    batch = 8

    key = jax.random.PRNGKey(0)
    k_params, k_x = jax.random.split(key)
    params = init_params(k_params, state_size, action_size, hidden_size)
    x = jax.random.normal(k_x, (batch, state_size), jnp.float32)

    prepped = prepare_params(params)                      # one-time prep, out of hot path
    out = jax.block_until_ready(net_forward(x, prepped))
    ref = jax.block_until_ready(net_forward_ref(x, params))

    assert out.shape == (batch, action_size)
    # bf16 MXU inputs + bf16 output stream -> looser tolerance vs f32 ref (outputs in [0,1]).
    assert jnp.allclose(out, ref, atol=2e-2, rtol=0.0), float(jnp.max(jnp.abs(out - ref)))
    print("KERNEL_OK")
</pallas_src>

<mosaic_0001>
module attributes {stable_mosaic.version = 11 : i64} {
  func.func @mlp_kernel(%arg0: i32, %arg1: memref<16x16xbf16, #tpu.memory_space<vmem>>, %arg2: memref<16x128xbf16, #tpu.memory_space<vmem>>, %arg3: memref<128x128xbf16, #tpu.memory_space<vmem>>, %arg4: memref<128x128xbf16, #tpu.memory_space<vmem>>, %arg5: memref<3x128xf32, #tpu.memory_space<vmem>>, %arg6: memref<16x128xbf16, #tpu.memory_space<vmem>>) attributes {dimension_semantics = [#tpu.dimension_semantics<parallel>], iteration_bounds = array<i64: 1>, scalar_prefetch = 0 : i64, scratch_operands = 0 : i64, tpu.core_type = #tpu.core_type<tc>, window_params = [{transform_indices = @transform_0, window_bounds = array<i64: 16, 16>}, {pipeline_mode = #tpu.pipeline_mode<synchronous>, transform_indices = @transform_1, window_bounds = array<i64: 16, 128>}, {pipeline_mode = #tpu.pipeline_mode<synchronous>, transform_indices = @transform_2, window_bounds = array<i64: 128, 128>}, {pipeline_mode = #tpu.pipeline_mode<synchronous>, transform_indices = @transform_3, window_bounds = array<i64: 128, 128>}, {pipeline_mode = #tpu.pipeline_mode<synchronous>, transform_indices = @transform_4, window_bounds = array<i64: 3, 128>}, {transform_indices = @transform_5, window_bounds = array<i64: 16, 128>}]} {
    %c0 = arith.constant 0 : index
    %c0_0 = arith.constant 0 : index
    %0 = vector.load %arg5[%c0, %c0_0] : memref<3x128xf32, #tpu.memory_space<vmem>>, vector<3x128xf32>
    %1 = vector.extract_strided_slice %0 {offsets = [0, 0], sizes = [1, 128], strides = [1, 1]} : vector<3x128xf32> to vector<1x128xf32>
    %2 = vector.extract_strided_slice %0 {offsets = [1, 0], sizes = [1, 128], strides = [1, 1]} : vector<3x128xf32> to vector<1x128xf32>
    %3 = vector.extract_strided_slice %0 {offsets = [2, 0], sizes = [1, 128], strides = [1, 1]} : vector<3x128xf32> to vector<1x128xf32>
    %c0_1 = arith.constant 0 : index
    %c0_2 = arith.constant 0 : index
    %4 = vector.load %arg2[%c0_1, %c0_2] : memref<16x128xbf16, #tpu.memory_space<vmem>>, vector<16x128xbf16>
    %c0_3 = arith.constant 0 : index
    %c0_4 = arith.constant 0 : index
    %5 = vector.load %arg3[%c0_3, %c0_4] : memref<128x128xbf16, #tpu.memory_space<vmem>>, vector<128x128xbf16>
    %c0_5 = arith.constant 0 : index
    %c0_6 = arith.constant 0 : index
    %6 = vector.load %arg4[%c0_5, %c0_6] : memref<128x128xbf16, #tpu.memory_space<vmem>>, vector<128x128xbf16>
    %c0_7 = arith.constant 0 : index
    %c0_8 = arith.constant 0 : index
    %7 = vector.load %arg1[%c0_7, %c0_8] : memref<16x16xbf16, #tpu.memory_space<vmem>>, vector<16x16xbf16>
    %cst = arith.constant dense<0.000000e+00> : vector<16x128xf32>
    %8 = tpu.matmul %7, %4, %cst {dimension_numbers = #tpu.dot_dimension_numbers<[1], [0], [0], [1], [0, 0, 1, 1], [], []>} : vector<16x16xbf16>, vector<16x128xbf16>, vector<16x128xf32> -> vector<16x128xf32>
    %9 = vector.broadcast %1 : vector<1x128xf32> to vector<16x128xf32>
    %10 = arith.addf %8, %9 : vector<16x128xf32>
    %cst_9 = arith.constant 5.000000e-01 : f32
    %11 = vector.broadcast %cst_9 : f32 to vector<16x128xf32>
    %12 = arith.mulf %11, %10 : vector<16x128xf32>
    %13 = math.tanh %12 : vector<16x128xf32>
    %cst_10 = arith.constant 5.000000e-01 : f32
    %14 = vector.broadcast %cst_10 : f32 to vector<16x128xf32>
    %15 = arith.mulf %14, %13 : vector<16x128xf32>
    %cst_11 = arith.constant 5.000000e-01 : f32
    %16 = vector.broadcast %cst_11 : f32 to vector<16x128xf32>
    %17 = arith.addf %15, %16 : vector<16x128xf32>
    %18 = arith.truncf %17 : vector<16x128xf32> to vector<16x128xbf16>
    %cst_12 = arith.constant dense<0.000000e+00> : vector<16x128xf32>
    %19 = tpu.matmul %18, %5, %cst_12 {dimension_numbers = #tpu.dot_dimension_numbers<[1], [0], [0], [1], [0, 0, 1, 1], [], []>} : vector<16x128xbf16>, vector<128x128xbf16>, vector<16x128xf32> -> vector<16x128xf32>
    %20 = vector.broadcast %2 : vector<1x128xf32> to vector<16x128xf32>
    %21 = arith.addf %19, %20 : vector<16x128xf32>
    %cst_13 = arith.constant 0.000000e+00 : f32
    %22 = vector.broadcast %cst_13 : f32 to vector<16x128xf32>
    %23 = arith.maximumf %21, %22 : vector<16x128xf32>
    %24 = arith.truncf %23 : vector<16x128xf32> to vector<16x128xbf16>
    %cst_14 = arith.constant dense<0.000000e+00> : vector<16x128xf32>
    %25 = tpu.matmul %24, %6, %cst_14 {dimension_numbers = #tpu.dot_dimension_numbers<[1], [0], [0], [1], [0, 0, 1, 1], [], []>} : vector<16x128xbf16>, vector<128x128xbf16>, vector<16x128xf32> -> vector<16x128xf32>
    %26 = vector.broadcast %3 : vector<1x128xf32> to vector<16x128xf32>
    %27 = arith.addf %25, %26 : vector<16x128xf32>
    %cst_15 = arith.constant 5.000000e-01 : f32
    %28 = vector.broadcast %cst_15 : f32 to vector<16x128xf32>
    %29 = arith.mulf %28, %27 : vector<16x128xf32>
    %30 = math.tanh %29 : vector<16x128xf32>
    %cst_16 = arith.constant 5.000000e-01 : f32
    %31 = vector.broadcast %cst_16 : f32 to vector<16x128xf32>
    %32 = arith.mulf %31, %30 : vector<16x128xf32>
    %cst_17 = arith.constant 5.000000e-01 : f32
    %33 = vector.broadcast %cst_17 : f32 to vector<16x128xf32>
    %34 = arith.addf %32, %33 : vector<16x128xf32>
    %35 = arith.truncf %34 : vector<16x128xf32> to vector<16x128xbf16>
    %c0_18 = arith.constant 0 : index
    %c0_19 = arith.constant 0 : index
    %36 = vector.load %arg6[%c0_18, %c0_19] : memref<16x128xbf16, #tpu.memory_space<vmem>>, vector<16x128xbf16>
    tpu.vector_store %arg6[%c0_18, %c0_19], %35 {strides = array<i32>} : memref<16x128xbf16, #tpu.memory_space<vmem>>, vector<16x128xbf16>,
    return
  }
  func.func @transform_0(%arg0: i32) -> (i32, i32) {
    %c0_i32 = arith.constant 0 : i32
    %c0_i32_0 = arith.constant 0 : i32
    return %arg0, %c0_i32 : i32, i32
  }
  func.func @transform_1(%arg0: i32) -> (i32, i32) {
    %c0_i32 = arith.constant 0 : i32
    %c0_i32_0 = arith.constant 0 : i32
    %c0_i32_1 = arith.constant 0 : i32
    return %c0_i32, %c0_i32_0 : i32, i32
  }
  func.func @transform_2(%arg0: i32) -> (i32, i32) {
    %c0_i32 = arith.constant 0 : i32
    %c0_i32_0 = arith.constant 0 : i32
    %c0_i32_1 = arith.constant 0 : i32
    return %c0_i32, %c0_i32_0 : i32, i32
  }
  func.func @transform_3(%arg0: i32) -> (i32, i32) {
    %c0_i32 = arith.constant 0 : i32
    %c0_i32_0 = arith.constant 0 : i32
    %c0_i32_1 = arith.constant 0 : i32
    return %c0_i32, %c0_i32_0 : i32, i32
  }
  func.func @transform_4(%arg0: i32) -> (i32, i32) {
    %c0_i32 = arith.constant 0 : i32
    %c0_i32_0 = arith.constant 0 : i32
    %c0_i32_1 = arith.constant 0 : i32
    return %c0_i32, %c0_i32_0 : i32, i32
  }
  func.func @transform_5(%arg0: i32) -> (i32, i32) {
    %c0_i32 = arith.constant 0 : i32
    %c0_i32_0 = arith.constant 0 : i32
    return %arg0, %c0_i32 : i32, i32
  }
}

</mosaic_0001>

<bundles_post_ra>
// kernel: tpu_custom_call.1
= control target key start
LH: loop header
LB: loop body
LE: loop exit
PB: predicated region body
PF: predicated region fallthrough
CT: control target
= control target key end

     0   :  { %10 = vsyncpa [#allocation3], 0  ;;  %s671_s0 = inlined_call_operand.hbm [shape: bf16[16,16], index: 0, kind: input, shape index: {}]   ;;  %s672_s1 = inlined_call_operand.hbm [shape: bf16[16,128], index: 1, kind: input, shape index: {}]   ;;  %s673_s2 = inlined_call_operand.hbm [shape: bf16[128,128], index: 2, kind: input, shape index: {}]   ;;  %s674_s3 = inlined_call_operand.hbm [shape: bf16[128,128], index: 3, kind: input, shape index: {}]   ;;  %s675_s4 = inlined_call_operand.hbm [shape: f32[3,128], index: 4, kind: input, shape index: {}]   ;;  %s676_s5 = inlined_call_operand.hbm [shape: bf16[16,128], index: 5, kind: output, shape index: {}]  }
   0x1   :  { %11 = vsyncpa [#allocation6], 0 }
   0x2   :  { %12 = vsyncpa [#allocation9], 0 }
   0x3   :  { %13 = vsyncpa [#allocation4], 0  ;;  %s31_s20 = sshll.u32 %s672_s1, 4  ;;  %s600_s21 = smov [#allocation5]   ;;  %s32_s20 = int_to_ptr.hbm [resolvable:$true] %s31_s20 }
   0x4   :  { %s33_s22 = sshll.u32 %s600_s21, 4  ;;  %s57_s25 = sshll.u32 %s674_s3, 4  ;;  %s34_s22 = int_to_ptr.vmem [resolvable:$true] %s33_s22  ;;  %s58_s25 = int_to_ptr.hbm [resolvable:$true] %s57_s25 }
   0x5   :  { %s601_s26 = smov 64   ;;  %s602_s27 = smov 4  }
   0x6   :  { %39 = dma.hbm_to_vmem [thread:$0]  %s32_s20, 128, %s34_s22, [#allocation6], %s601_s26, %s601_s26, %s602_s27  }
   0x7   :  { %s603_s28 = smov [#allocation8]   ;;  %s18_s1 = sshll.u32 %s671_s0, 4  ;;  %s19_s1 = int_to_ptr.hbm [resolvable:$true] %s18_s1 }
   0x8   :  { %s59_s29 = sshll.u32 %s603_s28, 4  ;;  %s44_s8 = sshll.u32 %s673_s2, 4  ;;  %s60_s29 = int_to_ptr.vmem [resolvable:$true] %s59_s29  ;;  %s45_s8 = int_to_ptr.hbm [resolvable:$true] %s44_s8 }
   0x9   :  { %65 = dma.hbm_to_vmem [thread:$0]  %s58_s25, 1024, %s60_s29, [#allocation9], %s601_s26, %s601_s26, %s602_s27  }
   0xa   :  { %s604_s9 = smov [#allocation2]   ;;  %s605_s11 = smov [#allocation7]  }
   0xb   :  { %s20_s10 = sshll.u32 %s604_s9, 4  ;;  %s46_s0 = sshll.u32 %s605_s11, 4  ;;  %s21_s10 = int_to_ptr.vmem [resolvable:$true] %s20_s10  ;;  %s47_s0 = int_to_ptr.vmem [resolvable:$true] %s46_s0 }
   0xc   :  { %26 = dma.hbm_to_vmem [thread:$0]  %s19_s1, 128, %s21_s10, [#allocation3], %s601_s26, %s601_s26, %s602_s27  }
   0xd   :  { %s71_s14 = sshll.u32 %s675_s4, 4  ;;  %s606_s2 = smov [#allocation10]   ;;  %s72_s14 = int_to_ptr.hbm [resolvable:$true] %s71_s14 }
   0xe   :  { %52 = dma.hbm_to_vmem [thread:$0]  %s45_s8, 1024, %s47_s0, [#allocation6], %s601_s26, %s601_s26, %s602_s27  }
   0xf   :  { %s73_s15 = sshll.u32 %s606_s2, 4  ;;  %s74_s15 = int_to_ptr.vmem [resolvable:$true] %s73_s15 }
  0x10   :  { %76 = dma.hbm_to_vmem [thread:$0]  %s72_s14, 64, %s74_s15, [#allocation9]  }
  0x11   :  { %592 = dma.done.wait [#allocation3], 128  }
  0x12   :  { %593 = vsyncadd [#allocation3], 4294967168 }
  0x13   :  { %594 = dma.done.wait [#allocation6], 1152  }
  0x14   :  { %595 = vsyncadd [#allocation6], 4294966144 }
  0x15   :  { %596 = dma.done.wait [#allocation9], 1088  }
  0x16   :  { %597 = vsyncadd [#allocation9], 4294966208  ;;  %v409_v0 = vld [vmem:[#allocation5] sm:$0xff]  ;;  %v426_v2 = vld [vmem:[#allocation2] sm:$0xff]  ;;  %vm147_vm0 = vcmask 130048   ;;  %s607_s4 = smov [#allocation11]  }
  0x17   :  { %v417_v1 = vld [vmem:[#allocation7 + $0x38] sm:$0xff]  ;;  %158 = vmatpush.bf16.msra.mxu0 %v409_v0  ;;  %v416_v3 = vld [vmem:[#allocation7 + $0x30] sm:$0xff]  ;;  %v415_v4 = vld [vmem:[#allocation7 + $0x28] sm:$0xff]  ;;  %s319_s16 = sshll.u32 %s607_s4, 4  ;;  %s321_s19 = sshll.u32 %s676_s5, 4  ;;  %s320_s16 = int_to_ptr.vmem [resolvable:$true] %s319_s16  ;;  %s322_s19 = int_to_ptr.hbm [resolvable:$true] %s321_s19 }
  0x18   :  { %223 = vmatpush.bf16.msra.mxu1 %v417_v1  ;;  %v414_v5 = vld [vmem:[#allocation7 + $0x20] sm:$0xff]  ;;  %v413_v6 = vld [vmem:[#allocation7 + $0x18] sm:$0xff]  ;;  %v412_v7 = vld [vmem:[#allocation7 + $0x10] sm:$0xff] }
  0x19   :  { %v411_v8 = vld [vmem:[#allocation7 + $0x8] sm:$0xff]  ;;  %v410_v9 = vld [vmem:[#allocation7] sm:$0xff]  ;;  %v425_v11 = vld [vmem:[#allocation8 + $0x38] sm:$0xff] }
  0x1a   :  { %344 = vmatmul.msk.bf16.vlgmr.msra.gmra.mxu0 %vm147_vm0, %v426_v2  ;;  %v98_v10 = vld [vmem:[#allocation10] sm:$0x7]  ;;  %289 = vmatpush.bf16.msra.mxu2 %v425_v11  ;;  %v424_v12 = vld [vmem:[#allocation8 + $0x30] sm:$0xff]  ;;  %v423_v15 = vld [vmem:[#allocation8 + $0x28] sm:$0xff] }
  0x1b   :  { %v135_v13 = vperm.slane %v98_v10, 0  ;;  %v422_v17 = vld [vmem:[#allocation8 + $0x20] sm:$0xff]  ;;  %v421_v29 = vld [vmem:[#allocation8 + $0x18] sm:$0xff]  ;;  %v420_v30 = vld [vmem:[#allocation8 + $0x10] sm:$0xff]  ;;  %v174_v34 = vperm.slane %v98_v10, 1  ;;  %v240_v41 = vperm.slane %v98_v10, 2 }
  0x1c   :  { %224 = vmatpush.bf16.msra.mxu1 %v416_v3  ;;  %v419_v31 = vld [vmem:[#allocation8 + $0x8] sm:$0xff]  ;;  %v418_v32 = vld [vmem:[#allocation8] sm:$0xff] }
  0x1e   :  { %290 = vmatpush.bf16.msra.mxu2 %v424_v12 }
  0x20   :  { %225 = vmatpush.bf16.msra.mxu1 %v415_v4 }
  0x22   :  { %291 = vmatpush.bf16.msra.mxu2 %v423_v15 }
  0x24   :  { %226 = vmatpush.bf16.msra.mxu1 %v414_v5 }
  0x26   :  { %292 = vmatpush.bf16.msra.mxu2 %v422_v17 }
  0x28   :  { %227 = vmatpush.bf16.msra.mxu1 %v413_v6 }
  0x2a   :  { %293 = vmatpush.bf16.msra.mxu2 %v421_v29 }
  0x2c   :  { %228 = vmatpush.bf16.msra.mxu1 %v412_v7 }
  0x2e   :  { %294 = vmatpush.bf16.msra.mxu2 %v420_v30 }
  0x30   :  { %229 = vmatpush.bf16.msra.mxu1 %v411_v8 }
  0x32   :  { %295 = vmatpush.bf16.msra.mxu2 %v419_v31 }
  0x34   :  { %230 = vmatpush.bf16.msra.mxu1 %v410_v9 }
  0x36   :  { %296 = vmatpush.bf16.msra.mxu2 %v418_v32 }
  0x97   :  { %v160_v14 = vpop.f32.mrf.mxu0 }
  0x98   :  { %v161_v16 = vadd.f32 %v160_v14, %v135_v13 }
  0x9a   :  { %v165_v18 = vmul.f32 0.5, %v161_v16 }
  0x9c   :  { %440 = vtanh.f32 %v165_v18 }
  0x9f   :  { %v162_v19 = vpop.f32.mrf.mxu0 }
  0xa0   :  { %v163_v20 = vadd.f32 %v162_v19, %v135_v13 }
  0xa2   :  { %v166_v21 = vmul.f32 0.5, %v163_v20  ;;  %v441_v22 = vpop.eup %440 }
  0xa3   :  { %v169_v23 = vmul.f32 0.5, %v441_v22 }
  0xa4   :  { %442 = vtanh.f32 %v166_v21 }
  0xa5   :  { %v171_v26 = vadd.f32 0.5, %v169_v23 }
  0xaa   :  { %v443_v24 = vpop.eup %442 }
  0xab   :  { %v170_v25 = vmul.f32 0.5, %v443_v24 }
  0xad   :  { %v172_v27 = vadd.f32 0.5, %v170_v25 }
  0xaf   :  { %v173_v28 = vpack.c.bf16 %v172_v27, %v171_v26 }
  0xb1   :  { %231 = vmatmul.bf16.vlgmr.msra.gmra.mxu1 %v173_v28 }
 0x12e   :  { %v232_v33 = vpop.f32.mrf.mxu1 }
 0x12f   :  { %v233_v35 = vadd.f32 %v232_v33, %v174_v34 }
 0x131   :  { %v237_v38 = vmax.f32 %v233_v35, 0.0 }
 0x136   :  { %v234_v36 = vpop.f32.mrf.mxu1 }
 0x137   :  { %v235_v37 = vadd.f32 %v234_v36, %v174_v34 }
 0x139   :  { %v238_v39 = vmax.f32 %v235_v37, 0.0 }
 0x13b   :  { %v239_v40 = vpack.c.bf16 %v238_v39, %v237_v38 }
 0x13d   :  { %297 = vmatmul.bf16.vlgmr.msra.gmra.mxu2 %v239_v40 }
 0x1c0   :  { %v298_v42 = vpop.f32.mrf.mxu2 }
 0x1c1   :  { %v299_v43 = vadd.f32 %v298_v42, %v240_v41 }
 0x1c3   :  { %v303_v44 = vmul.f32 0.5, %v299_v43 }
 0x1c5   :  { %444 = vtanh.f32 %v303_v44 }
 0x1c8   :  { %v300_v45 = vpop.f32.mrf.mxu2 }
 0x1c9   :  { %v301_v46 = vadd.f32 %v300_v45, %v240_v41 }
 0x1cb   :  { %v304_v47 = vmul.f32 0.5, %v301_v46  ;;  %v445_v48 = vpop.eup %444 }
 0x1cc   :  { %v307_v49 = vmul.f32 0.5, %v445_v48 }
 0x1cd   :  { %446 = vtanh.f32 %v304_v47 }
 0x1ce   :  { %v309_v52 = vadd.f32 0.5, %v307_v49 }
 0x1d3   :  { %v447_v50 = vpop.eup %446 }
 0x1d4   :  { %v308_v51 = vmul.f32 0.5, %v447_v50 }
 0x1d6   :  { %v310_v53 = vadd.f32 0.5, %v308_v51 }
 0x1d8   :  { %v430_v54 = vpack.c.bf16 %v310_v53, %v309_v52 }
 0x1da   :  { %431 = vst [vmem:[#allocation11] sm:$0xff] %v430_v54  }
 0x1db   :  { %327 = dma.vmem_to_hbm [thread:$0]  %s320_s16, 128, %s322_s19, [#allocation4], %s601_s26, %s601_s26, %s602_s27  }
 0x1dc   :  { %598 = dma.done.wait [#allocation4], 128  }
 0x1dd   :  { %599 = vsyncadd [#allocation4], 4294967168 }
 0x1de   :  { %332 = vsyncpa [#allocation3], 1 }
 0x1df   :  { %333 = vsyncpa [#allocation6], 1 }
 0x1e0   :  { %334 = vsyncpa [#allocation9], 1 }
 0x1e1   :  { %335 = vsyncpa [#allocation4], 1 }

</bundles_post_ra>
